<compile_context>
chip_gen: v5e
topology: v5e:2x2
jax: 0.10.0
libtpu: 0.0.40
codegen_flags: <defaults>
</compile_context>

<pallas_src>
import functools

import jax
import jax.numpy as jnp
from jax.experimental import pallas as pl
from jax.experimental.pallas import tpu as pltpu


def _ceil_to(a, m):
    return -(-a // m) * m


def _num_tensorcores():
    """Best-effort TensorCores-per-device count (megacore parts expose 2)."""
    try:
        info = pltpu.get_tpu_info()
        for attr in ("num_cores", "cores_per_chip", "tensorcores_per_chip",
                     "num_tensorcores"):
            v = getattr(info, attr, None)
            if isinstance(v, int) and v in (1, 2):
                return v
    except Exception:
        pass
    try:
        kind = getattr(jax.devices()[0], "device_kind", "").lower()
        if any(tag in kind for tag in ("v4", "v5p", "7x", "v7")):
            return 2
    except Exception:
        pass
    return 1


def _discretization_kernel(x_ref, o_ref, *, scale_a, scale_b, qscale):
    # out = A * round((clip(x, -1, 1) + 1) * qscale) + B
    # with A = 0.5*(max-min)/qscale, B = 0.5*(min+max) - 0.5*(max-min)
    x = x_ref[...]
    h = jnp.clip(x.astype(jnp.float32), -1.0, 1.0)
    q = jnp.round((h + 1.0) * qscale)          # round-half-to-even == torch.round
    o_ref[...] = (scale_a * q + scale_b).astype(o_ref.dtype)


def discretization(x, min_v=-1.0, max_v=1.0, discrt_lvls=2, donate_input=False):
    """Forward pass of the Discretization module (elementwise).

    x: any-shape float array (e.g. NCHW activations). Returns same shape/dtype.
    Requires discrt_lvls >= 2 (discrt_lvls == 1 would divide by zero).
    """
    if discrt_lvls < 2:
        raise ValueError("discrt_lvls must be >= 2")

    orig_shape = x.shape
    orig_dtype = x.dtype
    n = int(x.size)
    if n == 0:
        return x
    itemsize = jnp.dtype(orig_dtype).itemsize

    # Fold all constants into one multiply-add (Python floats -> immediates).
    qscale = (discrt_lvls - 1) / 2.0
    scale_a = 0.5 * (max_v - min_v) / qscale
    scale_b = 0.5 * (min_v + max_v) - 0.5 * (max_v - min_v)

    # Lane width: widest multiple of 128 that divides n exactly (zero-copy
    # reshape, unmasked full-width stores). Divisibility beats max width.
    lane = None
    for w in (4096, 2048, 1024, 512, 256, 128):
        if n % w == 0:
            lane = w
            break

    xf = x.reshape(-1)
    padded_tail = 0
    if lane is None:
        # TODO(synk): handle the <128-element ragged tail with a masked
        # in-kernel store instead of this pad + trailing slice (extra HBM
        # passes); only taken when no multiple of 128 divides n.
        lane = 128
        padded_tail = (-n) % lane
        xf = jnp.pad(xf, (0, padded_tail))
    total = n + padded_tail
    rows = total // lane
    x2d = xf.reshape(rows, lane)

    # Dtype-aware sublane granule: f32 -> 8, bf16/fp16 -> 16, int8/fp8 -> 32.
    granule = max(8, 32 // itemsize)
    num_tc = _num_tensorcores()

    # Block rows: target ~8 MiB per block (in+out double-buffered ~= 32 MiB,
    # fits v7x's 64 MiB VMEM with headroom; well within v5e/v6e's 128 MiB).
    target_block_bytes = 8 << 20
    base = max(granule, (target_block_bytes // (lane * itemsize)) // granule * granule)

    if rows <= base:
        # Whole array fits one block.
        if num_tc > 1 and rows >= 2 * granule:
            # Multi-TC part: split so both TensorCores get work.
            block_rows = _ceil_to(-(-rows // num_tc), granule)
        else:
            block_rows = rows               # full-dim block: always legal
    else:
        block_rows = base
        if num_tc > 1:
            # Make the block count a multiple of the TC count for even load.
            nb = -(-rows // block_rows)
            if nb % num_tc:
                nb_even = nb + (num_tc - nb % num_tc)
                block_rows = max(granule, _ceil_to(-(-rows // nb_even), granule))

    num_blocks = pl.cdiv(rows, block_rows)
    block_bytes = block_rows * lane * itemsize
    # VMEM: size to actual need (2x in + 2x out double buffers + margin),
    # never request the full physical VMEM (64 MiB on v7x).
    vmem_limit = int(min(48 << 20, max(16 << 20, 4 * block_bytes + (2 << 20))))

    kernel = functools.partial(
        _discretization_kernel,
        scale_a=float(scale_a),
        scale_b=float(scale_b),
        qscale=float(qscale),
    )

    out2d = pl.pallas_call(
        kernel,
        out_shape=jax.ShapeDtypeStruct((rows, lane), orig_dtype),
        grid_spec=pltpu.PrefetchScalarGridSpec(
            num_scalar_prefetch=0,
            grid=(num_blocks,),
            in_specs=[pl.BlockSpec((block_rows, lane), lambda i: (i, 0))],
            out_specs=pl.BlockSpec((block_rows, lane), lambda i: (i, 0)),
        ),
        compiler_params=pltpu.CompilerParams(
            dimension_semantics=("parallel",),
            vmem_limit_bytes=vmem_limit,
        ),
        cost_estimate=pl.CostEstimate(
            flops=6 * total,
            transcendentals=0,
            bytes_accessed=2 * total * itemsize,
        ),
        input_output_aliases=({0: 0} if donate_input else {}),
    )(x2d)

    out = out2d.reshape(-1)
    if padded_tail:
        out = out[:n]
    return out.reshape(orig_shape)


if __name__ == "__main__":
    key = jax.random.PRNGKey(0)
    k1, k2, k3 = jax.random.split(key, 3)

    # NCHW activations, small shapes consistent with the module's typical use.
    x1 = jax.random.normal(k1, (2, 4, 16, 16), dtype=jnp.float32) * 2.0   # n % 2048 == 0
    x2 = jax.random.normal(k2, (3, 5, 16, 16), dtype=jnp.float32) * 2.0   # ragged grid path
    x3 = jax.random.normal(k3, (2, 3, 7, 5), dtype=jnp.float32) * 2.0     # tail fallback path

    # Pure-JAX reference (same math as the PyTorch module, no Pallas)
    def ref(x, min_v=-1.0, max_v=1.0, L=2):
        s = (L - 1) / 2.0
        h = jnp.clip(x, -1.0, 1.0)
        d = jnp.round((h + 1.0) * s) / s - 1.0
        return 0.5 * (d * (max_v - min_v) + min_v + max_v)

    cases = [
        (x1, -1.0, 1.0, 2),   # module defaults
        (x2, -1.0, 1.0, 2),
        (x3, -2.0, 3.0, 5),   # non-default range / levels
    ]
    for xv, mn, mx, lvls in cases:
        y = jax.block_until_ready(discretization(xv, min_v=mn, max_v=mx, discrt_lvls=lvls))
        y_ref = ref(xv, mn, mx, lvls)
        assert y.shape == xv.shape and y.dtype == xv.dtype
        assert jnp.allclose(y, y_ref, atol=1e-5), "mismatch vs reference"

    print("KERNEL_OK")
</pallas_src>

<mosaic_0001>
module attributes {stable_mosaic.version = 11 : i64} {
  func.func @_discretization_kernel(%arg0: i32, %arg1: memref<1x2048xf32, #tpu.memory_space<vmem>>, %arg2: memref<1x2048xf32, #tpu.memory_space<vmem>>) attributes {dimension_semantics = [#tpu.dimension_semantics<parallel>], iteration_bounds = array<i64: 1>, scalar_prefetch = 0 : i64, scratch_operands = 0 : i64, tpu.core_type = #tpu.core_type<tc>, window_params = [{transform_indices = @transform_0, window_bounds = array<i64: 1, 2048>}, {transform_indices = @transform_1, window_bounds = array<i64: 1, 2048>}]} {
    %c0 = arith.constant 0 : index
    %c0_0 = arith.constant 0 : index
    %0 = vector.load %arg1[%c0, %c0_0] : memref<1x2048xf32, #tpu.memory_space<vmem>>, vector<1x2048xf32>
    %cst = arith.constant -1.000000e+00 : f32
    %cst_1 = arith.constant 1.000000e+00 : f32
    %1 = vector.broadcast %cst : f32 to vector<1x2048xf32>
    %2 = arith.maximumf %1, %0 : vector<1x2048xf32>
    %3 = vector.broadcast %cst_1 : f32 to vector<1x2048xf32>
    %4 = arith.minimumf %3, %2 : vector<1x2048xf32>
    %cst_2 = arith.constant 1.000000e+00 : f32
    %5 = vector.broadcast %cst_2 : f32 to vector<1x2048xf32>
    %6 = arith.addf %4, %5 : vector<1x2048xf32>
    %cst_3 = arith.constant 5.000000e-01 : f32
    %7 = vector.broadcast %cst_3 : f32 to vector<1x2048xf32>
    %8 = arith.mulf %6, %7 : vector<1x2048xf32>
    %9 = math.roundeven %8 : vector<1x2048xf32>
    %cst_4 = arith.constant 2.000000e+00 : f32
    %10 = vector.broadcast %cst_4 : f32 to vector<1x2048xf32>
    %11 = arith.mulf %10, %9 : vector<1x2048xf32>
    %cst_5 = arith.constant -1.000000e+00 : f32
    %12 = vector.broadcast %cst_5 : f32 to vector<1x2048xf32>
    %13 = arith.addf %11, %12 : vector<1x2048xf32>
    %c0_6 = arith.constant 0 : index
    %c0_7 = arith.constant 0 : index
    %14 = vector.load %arg2[%c0_6, %c0_7] : memref<1x2048xf32, #tpu.memory_space<vmem>>, vector<1x2048xf32>
    tpu.vector_store %arg2[%c0_6, %c0_7], %13 {strides = array<i32>} : memref<1x2048xf32, #tpu.memory_space<vmem>>, vector<1x2048xf32>,
    return
  }
  func.func @transform_0(%arg0: i32) -> (i32, i32) {
    %c0_i32 = arith.constant 0 : i32
    %c0_i32_0 = arith.constant 0 : i32
    return %arg0, %c0_i32 : i32, i32
  }
  func.func @transform_1(%arg0: i32) -> (i32, i32) {
    %c0_i32 = arith.constant 0 : i32
    %c0_i32_0 = arith.constant 0 : i32
    return %arg0, %c0_i32 : i32, i32
  }
}

</mosaic_0001>

<bundles_post_ra>
// kernel: tpu_custom_call.1
= control target key start
LH: loop header
LB: loop body
LE: loop exit
PB: predicated region body
PF: predicated region fallthrough
CT: control target
= control target key end

     0   :  { %6 = vsyncpa [#allocation3], 0  ;;  %s148_s0 = inlined_call_operand.hbm [shape: f32[1,2048], index: 0, kind: input, shape index: {}]   ;;  %s149_s1 = inlined_call_operand.hbm [shape: f32[1,2048], index: 1, kind: output, shape index: {}]  }
   0x1   :  { %7 = vsyncpa [#allocation4], 0  ;;  %s13_s8 = sshll.u32 %s148_s0, 4  ;;  %s130_s9 = smov [#allocation2]   ;;  %s14_s8 = int_to_ptr.hbm [resolvable:$true] %s13_s8 }
   0x2   :  { %s15_s10 = sshll.u32 %s130_s9, 4  ;;  %s16_s10 = int_to_ptr.vmem [resolvable:$true] %s15_s10 }
   0x3   :  { %18 = dma.hbm_to_vmem [thread:$0]  %s14_s8, 256, %s16_s10, [#allocation3]  }
   0x4   :  { %126 = dma.done.wait [#allocation3], 256  }
   0x5   :  { %127 = vsyncadd [#allocation3], 4294967040  ;;  %v23_v0 = vld [vmem:[#allocation2] sm:$0xff]  ;;  %v24_v1 = vld [vmem:[#allocation2 + $0x8] sm:$0xff]  ;;  %s131_s0 = smov [#allocation5]   ;;  %s48_s14 = sshll.u32 %s149_s1, 4  ;;  %s49_s14 = int_to_ptr.hbm [resolvable:$true] %s48_s14 }
   0x6   :  { %v58_v2 = vclamps-f32 %v23_v0, 1.0  ;;  %v59_v3 = vclamps-f32 %v24_v1, 1.0  ;;  %s46_s11 = sshll.u32 %s131_s0, 4  ;;  %s47_s11 = int_to_ptr.vmem [resolvable:$true] %s46_s11 }
   0x8   :  { %v29_v4 = vadd.f32 1.0, %v58_v2  ;;  %v30_v5 = vadd.f32 1.0, %v59_v3 }
   0xa   :  { %v31_v6 = vmul.f32 0.5, %v29_v4  ;;  %v32_v7 = vmul.f32 0.5, %v30_v5 }
   0xc   :  { %v62_v8 = vcvt.f32.s32 %v31_v6  ;;  %v60_v9 = vand.u32 2147483647, %v31_v6  ;;  %v70_v10 = vcvt.f32.s32 %v32_v7  ;;  %v65_v12 = vand.u32 2147483648, %v31_v6 }
   0xd   :  { %v68_v13 = vand.u32 2147483647, %v32_v7  ;;  %v73_v15 = vand.u32 2147483648, %v32_v7 }
   0xe   :  { %v63_v11 = vcvt.s32.f32 %v62_v8  ;;  %v71_v14 = vcvt.s32.f32 %v70_v10  ;;  %vm61_vm0 = vcmp.lt.f32.partialorder %v60_v9, 8388608.0 }
   0xf   :  { %vm69_vm1 = vcmp.lt.f32.partialorder %v68_v13, 8388608.0 }
  0x10   :  { %v64_v16 = vand.u32 2147483647, %v63_v11  ;;  %v72_v17 = vand.u32 2147483647, %v71_v14 }
  0x12   :  { %v66_v18 = vor.u32 %v65_v12, %v64_v16  ;;  %v74_v19 = vor.u32 %v73_v15, %v72_v17 }
  0x14   :  { %v67_v20 = vsel %vm61_vm0, %v66_v18, %v31_v6  ;;  %v75_v22 = vsel %vm69_vm1, %v74_v19, %v32_v7 }
  0x15   :  { %v35_v21 = vmul.f32 2.0, %v67_v20  ;;  %v36_v23 = vmul.f32 2.0, %v75_v22 }
  0x17   :  { %v37_v24 = vadd.f32 -1.0, %v35_v21  ;;  %v38_v25 = vadd.f32 -1.0, %v36_v23 }
  0x19   :  { %39 = vst [vmem:[#allocation5] sm:$0xff] %v37_v24 }
  0x1a   :  { %40 = vst [vmem:[#allocation5 + $0x8] sm:$0xff] %v38_v25 }
  0x1b   :  { %51 = dma.vmem_to_hbm [thread:$0]  %s47_s11, 256, %s49_s14, [#allocation4]  }
  0x1c   :  { %128 = dma.done.wait [#allocation4], 256  }
  0x1d   :  { %129 = vsyncadd [#allocation4], 4294967040 }
  0x1e   :  { %56 = vsyncpa [#allocation3], 1 }
  0x1f   :  { %57 = vsyncpa [#allocation4], 1 }

</bundles_post_ra>
